<compile_context>
chip_gen: v6e
topology: v6e:2x2x1
jax: 0.10.0
libtpu: 0.0.40
codegen_flags: <defaults>
</compile_context>

<pallas_src>
import jax
import jax.numpy as jnp
from jax.experimental import pallas as pl
from jax.experimental.pallas import tpu as pltpu


def _round_up(v, m):
    return (v + m - 1) // m * m


def _cdiv(a, b):
    return -(-a // b)


def _solution_u_kernel(
    x_ref,
    w1_ref, b1_ref,
    w2_ref, b2_ref,
    w3_ref, b3_ref,      # gate sigmoid(a0) pre-folded into W3 rows
    w4_ref, b4_ref,      # gate sigmoid(a1) pre-folded into W4 rows
    wf_ref, bf_ref,      # folded (diag(sigmoid(a2)) . W5) @ Wp1 ; b5 @ Wp1 + bp1
    wp2_ref, bp2_ref,    # final 32 -> 1 projection (kept f32, computed off-MXU)
    out_ref,
):
    md = w1_ref.dtype    # matmul dtype (bf16 by default); accumulation stays f32

    def dense_relu(v, w_ref, b_ref):
        acc = jnp.dot(v, w_ref[...], preferred_element_type=jnp.float32) + b_ref[...]
        return jnp.maximum(acc, 0.0)

    x = x_ref[...]                                     # (TB, 17) already in md

    # --- KAN encoder (gates folded into weights) ---
    h = dense_relu(x, w1_ref, b1_ref)                  # (TB, 60) f32
    h = dense_relu(h.astype(md), w2_ref, b2_ref)
    h = dense_relu(h.astype(md), w3_ref, b3_ref)
    h = dense_relu(h.astype(md), w4_ref, b4_ref)

    # --- Embedding (60->32, no activation) folded with Predictor layer 1 ---
    p = dense_relu(h.astype(md), wf_ref, bf_ref)       # (TB, 32) f32

    # --- Final 32 -> 1 projection off-MXU: VPU multiply + lane reduce (XLU) ---
    out = jnp.sum(p * wp2_ref[...], axis=-1, keepdims=True) + bp2_ref[...]  # (TB, 1)
    out_ref[...] = out.astype(out_ref.dtype)


def solution_u_forward(x, params, *, tile_b=2048, matmul_dtype=jnp.bfloat16):
    """x: (N, 17).  params: dict of weights stored as (in, out).

    Note: for genuinely tiny batches (N ~ 10) the pallas_call dispatch dominates;
    batch many requests into one call for real workloads.
    """
    assert tile_b % 128 == 0, "tile_b must be a multiple of 128 (lane width)"
    n, d_in = x.shape
    md = matmul_dtype
    f32 = jnp.float32

    # ----- Host-side weight folding (all in f32, cast to matmul dtype once) -----
    g0 = jax.nn.sigmoid(params["a0"].astype(f32))          # (1, 60)
    g1 = jax.nn.sigmoid(params["a1"].astype(f32))
    g2 = jax.nn.sigmoid(params["a2"].astype(f32))
    w3f = params["w3"].astype(f32) * g0.T                  # scale rows (in-dim) by g0
    w4f = params["w4"].astype(f32) * g1.T
    w5g = params["w5"].astype(f32) * g2.T                  # (60, 32)
    wfold = w5g @ params["wp1"].astype(f32)                # (60, 32)
    bfold = params["b5"].astype(f32) @ params["wp1"].astype(f32) \
            + params["bp1"].astype(f32)                    # (1, 32)

    ordered = [
        params["w1"].astype(md), params["b1"].astype(f32),
        params["w2"].astype(md), params["b2"].astype(f32),
        w3f.astype(md),          params["b3"].astype(f32),
        w4f.astype(md),          params["b4"].astype(f32),
        wfold.astype(md),        bfold,
        params["wp2"].reshape(1, -1).astype(f32),          # (1, 32), stays off-MXU
        params["bp2"].astype(f32),                         # (1, 1)
    ]

    # ----- Batch tiling -----
    # Pick the largest tile <= tile_b, but guarantee >= 2 grid steps when N > 128 so
    # the "parallel" axis shards across both TensorCores on v7x.  (For best v7x
    # load-balance prefer an even tile count at large N.)
    tb = min(tile_b, _round_up(max(n, 1), 128))
    if n > 128:
        tb = min(tb, _round_up(_cdiv(n, 2), 128))
    n_pad = _round_up(n, tb)
    num_tiles = n_pad // tb

    x = x.astype(md)                                       # DMA x in matmul dtype
    if n_pad != n:
        x = jnp.pad(x, ((0, n_pad - n), (0, 0)))           # finite (zero) padding

    # x is tiled over the batch; every weight/bias uses a constant index_map so it is
    # DMA'd once and stays VMEM-resident across grid steps.
    in_specs = [pl.BlockSpec((tb, d_in), lambda i: (i, 0))]
    for p_arr in ordered:
        in_specs.append(pl.BlockSpec(p_arr.shape, lambda i: (0, 0)))

    out = pl.pallas_call(
        _solution_u_kernel,
        out_shape=jax.ShapeDtypeStruct((n_pad, 1), jnp.float32),
        grid=(num_tiles,),
        in_specs=in_specs,
        out_specs=pl.BlockSpec((tb, 1), lambda i: (i, 0)),
        compiler_params=pltpu.CompilerParams(
            dimension_semantics=("parallel",),             # megacore sharding on v7x
            vmem_limit_bytes=32 * 1024 * 1024,
        ),
    )(x, *ordered)

    return out[:n]                                         # drop padded rows


def init_params(key):
    """Deterministic parameter init mirroring the PyTorch module:
    xavier_normal_ on Linear weights, zero biases, randn attention weights."""
    def xavier_normal(k, fan_in, fan_out):
        std = (2.0 / (fan_in + fan_out)) ** 0.5
        # stored as (in, out) so the kernel computes x @ W
        return std * jax.random.normal(k, (fan_in, fan_out), dtype=jnp.float32)

    keys = jax.random.split(key, 16)
    return {
        # KAN encoder: 17 -> 60 -> 60 -> 60 -> 60 -> 32
        "w1": xavier_normal(keys[0], 17, 60), "b1": jnp.zeros((1, 60), jnp.float32),
        "w2": xavier_normal(keys[1], 60, 60), "b2": jnp.zeros((1, 60), jnp.float32),
        "a0": jax.random.normal(keys[2], (1, 60), dtype=jnp.float32),
        "w3": xavier_normal(keys[3], 60, 60), "b3": jnp.zeros((1, 60), jnp.float32),
        "a1": jax.random.normal(keys[4], (1, 60), dtype=jnp.float32),
        "w4": xavier_normal(keys[5], 60, 60), "b4": jnp.zeros((1, 60), jnp.float32),
        "a2": jax.random.normal(keys[6], (1, 60), dtype=jnp.float32),
        "w5": xavier_normal(keys[7], 60, 32), "b5": jnp.zeros((1, 32), jnp.float32),
        # Predictor: 32 -> 32 -> 1
        "wp1": xavier_normal(keys[8], 32, 32), "bp1": jnp.zeros((1, 32), jnp.float32),
        "wp2": xavier_normal(keys[9], 32, 1), "bp2": jnp.zeros((1, 1), jnp.float32),
    }


def reference_forward(x, p):
    """Pure-JAX f32 reference that mirrors the original PyTorch forward exactly
    (no folding, explicit sigmoid gates)."""
    h = jax.nn.relu(x @ p["w1"] + p["b1"])
    h = jax.nn.relu(h @ p["w2"] + p["b2"]) * jax.nn.sigmoid(p["a0"])
    h = jax.nn.relu(h @ p["w3"] + p["b3"]) * jax.nn.sigmoid(p["a1"])
    h = jax.nn.relu(h @ p["w4"] + p["b4"]) * jax.nn.sigmoid(p["a2"])
    emb = h @ p["w5"] + p["b5"]
    q = jax.nn.relu(emb @ p["wp1"] + p["bp1"])
    return q @ p["wp2"] + p["bp2"]


if __name__ == "__main__":
    key = jax.random.PRNGKey(0)
    k_param, k_x = jax.random.split(key)

    params = init_params(k_param)
    x = jax.random.normal(k_x, (8, 17), dtype=jnp.float32)  # batch=8, input_dim=17

    ref = reference_forward(x, params)

    # Exact-semantics check: f32 matmuls vs. the f32 PyTorch-equivalent reference
    # (only floating-point associativity differs because of the weight folds).
    out_f32 = jax.block_until_ready(
        solution_u_forward(x, params, matmul_dtype=jnp.float32))
    assert out_f32.shape == (8, 1), out_f32.shape
    assert jnp.allclose(out_f32, ref, atol=1e-4, rtol=1e-4), (out_f32, ref)

    # Default (bf16 MXU inputs, f32 accumulate) path: loose tolerance vs f32 ref.
    out_bf16 = jax.block_until_ready(solution_u_forward(x, params))
    assert out_bf16.shape == (8, 1), out_bf16.shape
    assert jnp.all(jnp.isfinite(out_bf16))
    assert jnp.allclose(out_bf16, ref, atol=5e-2, rtol=1e-1), (out_bf16, ref)

    print("KERNEL_OK")
</pallas_src>

<mosaic_0001>
module attributes {stable_mosaic.version = 11 : i64} {
  func.func @_solution_u_kernel(%arg0: i32, %arg1: memref<128x17xf32, #tpu.memory_space<vmem>>, %arg2: memref<17x60xf32, #tpu.memory_space<vmem>>, %arg3: memref<1x60xf32, #tpu.memory_space<vmem>>, %arg4: memref<60x60xf32, #tpu.memory_space<vmem>>, %arg5: memref<1x60xf32, #tpu.memory_space<vmem>>, %arg6: memref<60x60xf32, #tpu.memory_space<vmem>>, %arg7: memref<1x60xf32, #tpu.memory_space<vmem>>, %arg8: memref<60x60xf32, #tpu.memory_space<vmem>>, %arg9: memref<1x60xf32, #tpu.memory_space<vmem>>, %arg10: memref<60x32xf32, #tpu.memory_space<vmem>>, %arg11: memref<1x32xf32, #tpu.memory_space<vmem>>, %arg12: memref<1x32xf32, #tpu.memory_space<vmem>>, %arg13: memref<1x1xf32, #tpu.memory_space<vmem>>, %arg14: memref<128x1xf32, #tpu.memory_space<vmem>>) attributes {dimension_semantics = [#tpu.dimension_semantics<parallel>], iteration_bounds = array<i64: 1>, scalar_prefetch = 0 : i64, scratch_operands = 0 : i64, tpu.core_type = #tpu.core_type<tc>, window_params = [{transform_indices = @transform_0, window_bounds = array<i64: 128, 17>}, {pipeline_mode = #tpu.pipeline_mode<synchronous>, transform_indices = @transform_1, window_bounds = array<i64: 17, 60>}, {pipeline_mode = #tpu.pipeline_mode<synchronous>, transform_indices = @transform_2, window_bounds = array<i64: 1, 60>}, {pipeline_mode = #tpu.pipeline_mode<synchronous>, transform_indices = @transform_3, window_bounds = array<i64: 60, 60>}, {pipeline_mode = #tpu.pipeline_mode<synchronous>, transform_indices = @transform_4, window_bounds = array<i64: 1, 60>}, {pipeline_mode = #tpu.pipeline_mode<synchronous>, transform_indices = @transform_5, window_bounds = array<i64: 60, 60>}, {pipeline_mode = #tpu.pipeline_mode<synchronous>, transform_indices = @transform_6, window_bounds = array<i64: 1, 60>}, {pipeline_mode = #tpu.pipeline_mode<synchronous>, transform_indices = @transform_7, window_bounds = array<i64: 60, 60>}, {pipeline_mode = #tpu.pipeline_mode<synchronous>, transform_indices = @transform_8, window_bounds = array<i64: 1, 60>}, {pipeline_mode = #tpu.pipeline_mode<synchronous>, transform_indices = @transform_9, window_bounds = array<i64: 60, 32>}, {pipeline_mode = #tpu.pipeline_mode<synchronous>, transform_indices = @transform_10, window_bounds = array<i64: 1, 32>}, {pipeline_mode = #tpu.pipeline_mode<synchronous>, transform_indices = @transform_11, window_bounds = array<i64: 1, 32>}, {pipeline_mode = #tpu.pipeline_mode<synchronous>, transform_indices = @transform_12, window_bounds = array<i64: 1, 1>}, {transform_indices = @transform_13, window_bounds = array<i64: 128, 1>}]} {
    %c0 = arith.constant 0 : index
    %c0_0 = arith.constant 0 : index
    %0 = vector.load %arg1[%c0, %c0_0] : memref<128x17xf32, #tpu.memory_space<vmem>>, vector<128x17xf32>
    %c0_1 = arith.constant 0 : index
    %c0_2 = arith.constant 0 : index
    %1 = vector.load %arg2[%c0_1, %c0_2] : memref<17x60xf32, #tpu.memory_space<vmem>>, vector<17x60xf32>
    %cst = arith.constant dense<0.000000e+00> : vector<128x60xf32>
    %2 = tpu.matmul %0, %1, %cst {dimension_numbers = #tpu.dot_dimension_numbers<[1], [0], [0], [1], [0, 0, 1, 1], [], []>} : vector<128x17xf32>, vector<17x60xf32>, vector<128x60xf32> -> vector<128x60xf32>
    %c0_3 = arith.constant 0 : index
    %c0_4 = arith.constant 0 : index
    %3 = vector.load %arg3[%c0_3, %c0_4] : memref<1x60xf32, #tpu.memory_space<vmem>>, vector<1x60xf32>
    %4 = vector.broadcast %3 : vector<1x60xf32> to vector<128x60xf32>
    %5 = arith.addf %2, %4 : vector<128x60xf32>
    %cst_5 = arith.constant 0.000000e+00 : f32
    %6 = vector.broadcast %cst_5 : f32 to vector<128x60xf32>
    %7 = arith.maximumf %5, %6 : vector<128x60xf32>
    %c0_6 = arith.constant 0 : index
    %c0_7 = arith.constant 0 : index
    %8 = vector.load %arg4[%c0_6, %c0_7] : memref<60x60xf32, #tpu.memory_space<vmem>>, vector<60x60xf32>
    %cst_8 = arith.constant dense<0.000000e+00> : vector<128x60xf32>
    %9 = tpu.matmul %7, %8, %cst_8 {dimension_numbers = #tpu.dot_dimension_numbers<[1], [0], [0], [1], [0, 0, 1, 1], [], []>} : vector<128x60xf32>, vector<60x60xf32>, vector<128x60xf32> -> vector<128x60xf32>
    %c0_9 = arith.constant 0 : index
    %c0_10 = arith.constant 0 : index
    %10 = vector.load %arg5[%c0_9, %c0_10] : memref<1x60xf32, #tpu.memory_space<vmem>>, vector<1x60xf32>
    %11 = vector.broadcast %10 : vector<1x60xf32> to vector<128x60xf32>
    %12 = arith.addf %9, %11 : vector<128x60xf32>
    %cst_11 = arith.constant 0.000000e+00 : f32
    %13 = vector.broadcast %cst_11 : f32 to vector<128x60xf32>
    %14 = arith.maximumf %12, %13 : vector<128x60xf32>
    %c0_12 = arith.constant 0 : index
    %c0_13 = arith.constant 0 : index
    %15 = vector.load %arg6[%c0_12, %c0_13] : memref<60x60xf32, #tpu.memory_space<vmem>>, vector<60x60xf32>
    %cst_14 = arith.constant dense<0.000000e+00> : vector<128x60xf32>
    %16 = tpu.matmul %14, %15, %cst_14 {dimension_numbers = #tpu.dot_dimension_numbers<[1], [0], [0], [1], [0, 0, 1, 1], [], []>} : vector<128x60xf32>, vector<60x60xf32>, vector<128x60xf32> -> vector<128x60xf32>
    %c0_15 = arith.constant 0 : index
    %c0_16 = arith.constant 0 : index
    %17 = vector.load %arg7[%c0_15, %c0_16] : memref<1x60xf32, #tpu.memory_space<vmem>>, vector<1x60xf32>
    %18 = vector.broadcast %17 : vector<1x60xf32> to vector<128x60xf32>
    %19 = arith.addf %16, %18 : vector<128x60xf32>
    %cst_17 = arith.constant 0.000000e+00 : f32
    %20 = vector.broadcast %cst_17 : f32 to vector<128x60xf32>
    %21 = arith.maximumf %19, %20 : vector<128x60xf32>
    %c0_18 = arith.constant 0 : index
    %c0_19 = arith.constant 0 : index
    %22 = vector.load %arg8[%c0_18, %c0_19] : memref<60x60xf32, #tpu.memory_space<vmem>>, vector<60x60xf32>
    %cst_20 = arith.constant dense<0.000000e+00> : vector<128x60xf32>
    %23 = tpu.matmul %21, %22, %cst_20 {dimension_numbers = #tpu.dot_dimension_numbers<[1], [0], [0], [1], [0, 0, 1, 1], [], []>} : vector<128x60xf32>, vector<60x60xf32>, vector<128x60xf32> -> vector<128x60xf32>
    %c0_21 = arith.constant 0 : index
    %c0_22 = arith.constant 0 : index
    %24 = vector.load %arg9[%c0_21, %c0_22] : memref<1x60xf32, #tpu.memory_space<vmem>>, vector<1x60xf32>
    %25 = vector.broadcast %24 : vector<1x60xf32> to vector<128x60xf32>
    %26 = arith.addf %23, %25 : vector<128x60xf32>
    %cst_23 = arith.constant 0.000000e+00 : f32
    %27 = vector.broadcast %cst_23 : f32 to vector<128x60xf32>
    %28 = arith.maximumf %26, %27 : vector<128x60xf32>
    %c0_24 = arith.constant 0 : index
    %c0_25 = arith.constant 0 : index
    %29 = vector.load %arg10[%c0_24, %c0_25] : memref<60x32xf32, #tpu.memory_space<vmem>>, vector<60x32xf32>
    %cst_26 = arith.constant dense<0.000000e+00> : vector<128x32xf32>
    %30 = tpu.matmul %28, %29, %cst_26 {dimension_numbers = #tpu.dot_dimension_numbers<[1], [0], [0], [1], [0, 0, 1, 1], [], []>} : vector<128x60xf32>, vector<60x32xf32>, vector<128x32xf32> -> vector<128x32xf32>
    %c0_27 = arith.constant 0 : index
    %c0_28 = arith.constant 0 : index
    %31 = vector.load %arg11[%c0_27, %c0_28] : memref<1x32xf32, #tpu.memory_space<vmem>>, vector<1x32xf32>
    %32 = vector.broadcast %31 : vector<1x32xf32> to vector<128x32xf32>
    %33 = arith.addf %30, %32 : vector<128x32xf32>
    %cst_29 = arith.constant 0.000000e+00 : f32
    %34 = vector.broadcast %cst_29 : f32 to vector<128x32xf32>
    %35 = arith.maximumf %33, %34 : vector<128x32xf32>
    %c0_30 = arith.constant 0 : index
    %c0_31 = arith.constant 0 : index
    %36 = vector.load %arg12[%c0_30, %c0_31] : memref<1x32xf32, #tpu.memory_space<vmem>>, vector<1x32xf32>
    %37 = vector.broadcast %36 : vector<1x32xf32> to vector<128x32xf32>
    %38 = arith.mulf %35, %37 : vector<128x32xf32>
    %cst_32 = arith.constant dense<0.000000e+00> : vector<128xf32>
    %39 = vector.multi_reduction <add>, %38, %cst_32 [1] : vector<128x32xf32> to vector<128xf32>
    %40 = vector.shape_cast %39 : vector<128xf32> to vector<128x1xf32>
    %c0_33 = arith.constant 0 : index
    %c0_34 = arith.constant 0 : index
    %41 = vector.load %arg13[%c0_33, %c0_34] : memref<1x1xf32, #tpu.memory_space<vmem>>, vector<1x1xf32>
    %42 = vector.broadcast %41 : vector<1x1xf32> to vector<128x1xf32>
    %43 = arith.addf %40, %42 : vector<128x1xf32>
    %c0_35 = arith.constant 0 : index
    %c0_36 = arith.constant 0 : index
    %44 = vector.load %arg14[%c0_35, %c0_36] : memref<128x1xf32, #tpu.memory_space<vmem>>, vector<128x1xf32>
    tpu.vector_store %arg14[%c0_35, %c0_36], %43 {strides = array<i32>} : memref<128x1xf32, #tpu.memory_space<vmem>>, vector<128x1xf32>,
    return
  }
  func.func @transform_0(%arg0: i32) -> (i32, i32) {
    %c0_i32 = arith.constant 0 : i32
    %c0_i32_0 = arith.constant 0 : i32
    return %arg0, %c0_i32 : i32, i32
  }
  func.func @transform_1(%arg0: i32) -> (i32, i32) {
    %c0_i32 = arith.constant 0 : i32
    %c0_i32_0 = arith.constant 0 : i32
    %c0_i32_1 = arith.constant 0 : i32
    return %c0_i32, %c0_i32_0 : i32, i32
  }
  func.func @transform_2(%arg0: i32) -> (i32, i32) {
    %c0_i32 = arith.constant 0 : i32
    %c0_i32_0 = arith.constant 0 : i32
    %c0_i32_1 = arith.constant 0 : i32
    return %c0_i32, %c0_i32_0 : i32, i32
  }
  func.func @transform_3(%arg0: i32) -> (i32, i32) {
    %c0_i32 = arith.constant 0 : i32
    %c0_i32_0 = arith.constant 0 : i32
    %c0_i32_1 = arith.constant 0 : i32
    return %c0_i32, %c0_i32_0 : i32, i32
  }
  func.func @transform_4(%arg0: i32) -> (i32, i32) {
    %c0_i32 = arith.constant 0 : i32
    %c0_i32_0 = arith.constant 0 : i32
    %c0_i32_1 = arith.constant 0 : i32
    return %c0_i32, %c0_i32_0 : i32, i32
  }
  func.func @transform_5(%arg0: i32) -> (i32, i32) {
    %c0_i32 = arith.constant 0 : i32
    %c0_i32_0 = arith.constant 0 : i32
    %c0_i32_1 = arith.constant 0 : i32
    return %c0_i32, %c0_i32_0 : i32, i32
  }
  func.func @transform_6(%arg0: i32) -> (i32, i32) {
    %c0_i32 = arith.constant 0 : i32
    %c0_i32_0 = arith.constant 0 : i32
    %c0_i32_1 = arith.constant 0 : i32
    return %c0_i32, %c0_i32_0 : i32, i32
  }
  func.func @transform_7(%arg0: i32) -> (i32, i32) {
    %c0_i32 = arith.constant 0 : i32
    %c0_i32_0 = arith.constant 0 : i32
    %c0_i32_1 = arith.constant 0 : i32
    return %c0_i32, %c0_i32_0 : i32, i32
  }
  func.func @transform_8(%arg0: i32) -> (i32, i32) {
    %c0_i32 = arith.constant 0 : i32
    %c0_i32_0 = arith.constant 0 : i32
    %c0_i32_1 = arith.constant 0 : i32
    return %c0_i32, %c0_i32_0 : i32, i32
  }
  func.func @transform_9(%arg0: i32) -> (i32, i32) {
    %c0_i32 = arith.constant 0 : i32
    %c0_i32_0 = arith.constant 0 : i32
    %c0_i32_1 = arith.constant 0 : i32
    return %c0_i32, %c0_i32_0 : i32, i32
  }
  func.func @transform_10(%arg0: i32) -> (i32, i32) {
    %c0_i32 = arith.constant 0 : i32
    %c0_i32_0 = arith.constant 0 : i32
    %c0_i32_1 = arith.constant 0 : i32
    return %c0_i32, %c0_i32_0 : i32, i32
  }
  func.func @transform_11(%arg0: i32) -> (i32, i32) {
    %c0_i32 = arith.constant 0 : i32
    %c0_i32_0 = arith.constant 0 : i32
    %c0_i32_1 = arith.constant 0 : i32
    return %c0_i32, %c0_i32_0 : i32, i32
  }
  func.func @transform_12(%arg0: i32) -> (i32, i32) {
    %c0_i32 = arith.constant 0 : i32
    %c0_i32_0 = arith.constant 0 : i32
    %c0_i32_1 = arith.constant 0 : i32
    return %c0_i32, %c0_i32_0 : i32, i32
  }
  func.func @transform_13(%arg0: i32) -> (i32, i32) {
    %c0_i32 = arith.constant 0 : i32
    %c0_i32_0 = arith.constant 0 : i32
    return %arg0, %c0_i32 : i32, i32
  }
}

</mosaic_0001>

<bundles_post_ra>
// kernel: tpu_custom_call.1
= control target key start
LH: loop header
LB: loop body
LE: loop exit
PB: predicated region body
PF: predicated region fallthrough
CT: control target
= control target key end

     0   :  { %vm121_vm0 = vcmask 1040384   ;;  %vm72_vm1 = vcmask 138240   ;;  %vm350_vm2 = vcmask 1043456   ;;  %vm301_vm3 = vcmask 490496   ;;  %s2163_s1 = inlined_call_operand.vmem [shape: f32[17,60], index: 1, kind: input, shape index: {}]   ;;  %s2164_s0 = inlined_call_operand.vmem [shape: f32[128,17], index: 0, kind: input, shape index: {}]   ;;  %s2165_s3 = inlined_call_operand.vmem [shape: f32[60,60], index: 3, kind: input, shape index: {}]   ;;  %s2166_s5 = inlined_call_operand.vmem [shape: f32[60,60], index: 5, kind: input, shape index: {}]   ;;  %s2167_s2 = inlined_call_operand.vmem [shape: f32[1,60], index: 2, kind: input, shape index: {}]   ;;  %s2168_s7 = inlined_call_operand.vmem [shape: f32[60,60], index: 7, kind: input, shape index: {}]   ;;  %s2169_s4 = inlined_call_operand.vmem [shape: f32[1,60], index: 4, kind: input, shape index: {}]   ;;  %s2170_s9 = inlined_call_operand.vmem [shape: f32[60,32], index: 9, kind: input, shape index: {}]   ;;  %s2171_s6 = inlined_call_operand.vmem [shape: f32[1,60], index: 6, kind: input, shape index: {}]   ;;  %s2172_s8 = inlined_call_operand.vmem [shape: f32[1,60], index: 8, kind: input, shape index: {}]   ;;  %s2173_s12 = inlined_call_operand.<no memory space> [shape: f32[1,1], index: 12, kind: input, shape index: {}]   ;;  %s2174_s10 = inlined_call_operand.vmem [shape: f32[1,32], index: 10, kind: input, shape index: {}]   ;;  %s2175_s11 = inlined_call_operand.vmem [shape: f32[1,32], index: 11, kind: input, shape index: {}]   ;;  %s2176_s13 = inlined_call_operand.vmem [shape: f32[128,1], index: 13, kind: output, shape index: {}]  }
   0x1   :  { %v64_v0 = vld [vmem:[%s2163_s1 + $0x10] sm:$0x1]  ;;  %v63_v1 = vld [vmem:[%s2163_s1 + $0x8] sm:$0xff]  ;;  %v46_v2 = vld [vmem:[%s2164_s0] sm:$0xff]  ;;  %vm1219_vm4 = vcmask 261120   ;;  %vm1291_vm5 = vcmask 7168  }
   0x2   :  { %1519 = vmatprep.subr.msk.mxu0 %vm121_vm0, %v64_v0  ;;  %1709 = vmatprep.subr.msk.mxu1 %vm121_vm0, %v64_v0  ;;  %v62_v3 = vld [vmem:[%s2163_s1] sm:$0xff]  ;;  %v47_v4 = vld [vmem:[%s2164_s0 + $0x8] sm:$0xff]  ;;  %v48_v5 = vld [vmem:[%s2164_s0 + $0x10] sm:$0xff] }
   0x3   :  { %1520 = vmatpush3.msk.msra.mxu0 %vm121_vm0, %v64_v0  ;;  %1525 = vmatprep.mubr.msk.f32.mxu0 %vm72_vm1, %v46_v2  ;;  %v54_v6 = vld [vmem:[%s2164_s0 + $0x40] sm:$0xff]  ;;  %v55_v7 = vld [vmem:[%s2164_s0 + $0x48] sm:$0xff]  ;;  %v293_v8 = vld [vmem:[%s2165_s3 + $0x38] sm:$0xf] }
   0x4   :  { %1521 = vmatprep.subr.mxu0 %v63_v1  ;;  %1712 = vmatpush3.msk.msra.mxu1 %vm121_vm0, %v64_v0  ;;  %v56_v9 = vld [vmem:[%s2164_s0 + $0x50] sm:$0xff]  ;;  %v49_v10 = vld [vmem:[%s2164_s0 + $0x18] sm:$0xff]  ;;  %v50_v12 = vld [vmem:[%s2164_s0 + $0x20] sm:$0xff] }
   0x5   :  { %1522 = vmatpush3.msra.mxu0 %v63_v1  ;;  %1710 = vmatprep.subr.mxu1 %v63_v1  ;;  %v292_v11 = vld [vmem:[%s2165_s3 + $0x30] sm:$0xff]  ;;  %v57_v13 = vld [vmem:[%s2164_s0 + $0x58] sm:$0xff]  ;;  %v291_v14 = vld [vmem:[%s2165_s3 + $0x28] sm:$0xff] }
   0x6   :  { %1523 = vmatprep.subr.mxu0 %v62_v3  ;;  %1713 = vmatpush3.msra.mxu1 %v63_v1  ;;  %v58_v15 = vld [vmem:[%s2164_s0 + $0x60] sm:$0xff]  ;;  %v51_v16 = vld [vmem:[%s2164_s0 + $0x28] sm:$0xff]  ;;  %v52_v18 = vld [vmem:[%s2164_s0 + $0x30] sm:$0xff] }
   0x7   :  { %1524 = vmatpush3.msra.mxu0 %v62_v3  ;;  %1711 = vmatprep.subr.mxu1 %v62_v3  ;;  %v290_v17 = vld [vmem:[%s2165_s3 + $0x20] sm:$0xff]  ;;  %v59_v19 = vld [vmem:[%s2164_s0 + $0x68] sm:$0xff]  ;;  %v289_v20 = vld [vmem:[%s2165_s3 + $0x18] sm:$0xff] }
   0x8   :  { %1526 = vmatmul.mubr.msk.f32.vlgmr.msra.gmra.mxu0 %vm72_vm1, %v47_v4  ;;  %1714 = vmatpush3.msra.mxu1 %v62_v3  ;;  %v60_v21 = vld [vmem:[%s2164_s0 + $0x70] sm:$0xff]  ;;  %v53_v22 = vld [vmem:[%s2164_s0 + $0x38] sm:$0xff]  ;;  %v287_v25 = vld [vmem:[%s2165_s3 + $0x8] sm:$0xff] }
   0x9   :  { %1528 = vmatprep.mubr.msk.f32.mxu0 %vm72_vm1, %v48_v5  ;;  %1537 = vmatprep.mubr.msk.f32.mxu1 %vm72_vm1, %v54_v6  ;;  %v61_v23 = vld [vmem:[%s2164_s0 + $0x78] sm:$0xff]  ;;  %v288_v24 = vld [vmem:[%s2165_s3 + $0x10] sm:$0xff]  ;;  %v286_v26 = vld [vmem:[%s2165_s3] sm:$0xff] }
   0xa   :  { %1538 = vmatmul.mubr.msk.f32.vlgmr.msra.gmra.mxu1 %vm72_vm1, %v55_v7  ;;  %1549 = vmatprep.subr.msk.mxu1 %vm350_vm2, %v293_v8  ;;  %v522_v27 = vld [vmem:[%s2166_s5 + $0x38] sm:$0xf]  ;;  %v521_v28 = vld [vmem:[%s2166_s5 + $0x30] sm:$0xff]  ;;  %v520_v29 = vld [vmem:[%s2166_s5 + $0x28] sm:$0xff] }
   0xb   :  { %1540 = vmatprep.mubr.msk.f32.mxu1 %vm72_vm1, %v56_v9  ;;  %1550 = vmatpush3.msk.msra.mxu1 %vm350_vm2, %v293_v8  ;;  %v519_v30 = vld [vmem:[%s2166_s5 + $0x20] sm:$0xff]  ;;  %v518_v31 = vld [vmem:[%s2166_s5 + $0x18] sm:$0xff] }
   0xc   :  { %1529 = vmatmul.mubr.msk.f32.gmra.mxu0 %vm72_vm1, %v49_v10  ;;  %1551 = vmatprep.subr.mxu1 %v292_v11  ;;  %v1312_v32 = vld [vmem:[%s2167_s2] ss:$0 sm:$0xff] }
   0xd   :  { %1531 = vmatprep.mubr.msk.f32.mxu0 %vm72_vm1, %v50_v12  ;;  %1552 = vmatpush3.msra.mxu1 %v292_v11 }
   0xe   :  { %1541 = vmatmul.mubr.msk.f32.gmra.mxu1 %vm72_vm1, %v57_v13  ;;  %1553 = vmatprep.subr.mxu1 %v291_v14 }
   0xf   :  { %1543 = vmatprep.mubr.msk.f32.mxu1 %vm72_vm1, %v58_v15  ;;  %1554 = vmatpush3.msra.mxu1 %v291_v14 }
  0x10   :  { %1532 = vmatmul.mubr.msk.f32.gmra.mxu0 %vm72_vm1, %v51_v16  ;;  %1555 = vmatprep.subr.mxu1 %v290_v17 }
  0x11   :  { %1534 = vmatprep.mubr.msk.f32.mxu0 %vm72_vm1, %v52_v18  ;;  %1556 = vmatpush3.msra.mxu1 %v290_v17  ;;  %v517_v17 = vld [vmem:[%s2166_s5 + $0x10] sm:$0xff]  ;;  %v516_v18 = vld [vmem:[%s2166_s5 + $0x8] sm:$0xff] }
  0x12   :  { %1544 = vmatmul.mubr.msk.f32.gmra.mxu1 %vm72_vm1, %v59_v19  ;;  %1557 = vmatprep.subr.mxu1 %v289_v20  ;;  %v515_v19 = vld [vmem:[%s2166_s5] sm:$0xff] }
  0x13   :  { %1546 = vmatprep.mubr.msk.f32.mxu1 %vm72_vm1, %v60_v21  ;;  %1558 = vmatpush3.msra.mxu1 %v289_v20  ;;  %v749_v20 = vld [vmem:[%s2168_s7 + $0x38] sm:$0xf]  ;;  %v748_v21 = vld [vmem:[%s2168_s7 + $0x30] sm:$0xff] }
  0x14   :  { %1535 = vmatmul.mubr.msk.f32.gmra.mxu0 %vm72_vm1, %v53_v22  ;;  %1559 = vmatprep.subr.mxu1 %v288_v24  ;;  %v747_v22 = vld [vmem:[%s2168_s7 + $0x28] sm:$0xff] }
  0x15   :  { %1560 = vmatpush3.msra.mxu1 %v288_v24  ;;  %1589 = vmatprep.subr.msk.mxu0 %vm350_vm2, %v522_v27  ;;  %v745_v24 = vld [vmem:[%s2168_s7 + $0x18] sm:$0xff] }
  0x16   :  { %1547 = vmatmul.mubr.msk.f32.gmra.mxu1 %vm72_vm1, %v61_v23  ;;  %1561 = vmatprep.subr.mxu1 %v287_v25  ;;  %v746_v23 = vld [vmem:[%s2168_s7 + $0x20] sm:$0xff] }
  0x17   :  { %1562 = vmatpush3.msra.mxu1 %v287_v25  ;;  %1590 = vmatpush3.msk.msra.mxu0 %vm350_vm2, %v522_v27  ;;  %v744_v25 = vld [vmem:[%s2168_s7 + $0x10] sm:$0xff]  ;;  %v1330_v27 = vld [vmem:[%s2169_s4] ss:$0 sm:$0xff] }
  0x18   :  { %1563 = vmatprep.subr.mxu1 %v286_v26  ;;  %1591 = vmatprep.subr.mxu0 %v521_v28 }
  0x19   :  { %1564 = vmatpush3.msra.mxu1 %v286_v26  ;;  %1592 = vmatpush3.msra.mxu0 %v521_v28  ;;  %v743_v26 = vld [vmem:[%s2168_s7 + $0x8] sm:$0xff] }
  0x1a   :  { %1593 = vmatprep.subr.mxu0 %v520_v29  ;;  %1629 = vmatprep.subr.msk.mxu1 %vm350_vm2, %v749_v20 }
  0x1b   :  { %1594 = vmatpush3.msra.mxu0 %v520_v29 }
  0x1c   :  { %1595 = vmatprep.subr.mxu0 %v519_v30 }
  0x1d   :  { %1596 = vmatpush3.msra.mxu0 %v519_v30 }
  0x1e   :  { %1597 = vmatprep.subr.mxu0 %v518_v31 }
  0x1f   :  { %1598 = vmatpush3.msra.mxu0 %v518_v31 }
  0x20   :  { %1599 = vmatprep.subr.mxu0 %v517_v17 }
  0x21   :  { %1600 = vmatpush3.msra.mxu0 %v517_v17  ;;  %v972_v17 = vld [vmem:[%s2170_s9 + $0x18] sm:$0xff] }
  0x22   :  { %1601 = vmatprep.subr.mxu0 %v516_v18 }
  0x23   :  { %1602 = vmatpush3.msra.mxu0 %v516_v18  ;;  %v971_v18 = vld [vmem:[%s2170_s9 + $0x10] sm:$0xff] }
  0x24   :  { %1603 = vmatprep.subr.mxu0 %v515_v19 }
  0x25   :  { %1604 = vmatpush3.msra.mxu0 %v515_v19  ;;  %v970_v19 = vld [vmem:[%s2170_s9 + $0x8] sm:$0xff] }
  0xc8   :  { %v1527_v33 = vpop.f32.mrf.mxu0 }
  0xc9   :  { %v197_v34 = vadd.f32 %v1527_v33, %v1312_v32 }
  0xca   :  { %v191_v35 = vpop.f32.mrf.mxu0  ;;  %v1539_v36 = vpop.f32.mrf.mxu1 }
  0xcb   :  { %v192_v37 = vadd.f32 %v1312_v32, %v191_v35  ;;  %v271_v41 = vmax.f32 %v197_v34, 0.0  ;;  %v237_v63 = vadd.f32 %v1539_v36, %v1312_v32 }
  0xcc   :  { %v1530_v38 = vpop.f32.mrf.mxu0  ;;  %v231_v39 = vpop.f32.mrf.mxu1 }
  0xcd   :  { %v270_v40 = vmax.f32 %v192_v37, 0.0  ;;  %v207_v42 = vadd.f32 %v1530_v38, %v1312_v32  ;;  %v232_v58 = vadd.f32 %v1312_v32, %v231_v39  ;;  %v279_v4 = vmax.f32 %v237_v63, 0.0 }
  0xce   :  { %v201_v43 = vpop.f32.mrf.mxu0  ;;  %v1542_v44 = vpop.f32.mrf.mxu1 }
  0xcf   :  { %v202_v45 = vadd.f32 %v1312_v32, %v201_v43  ;;  %1565 = vmatprep.mubr.msk.f32.mxu1 %vm301_vm3, %v270_v40  ;;  %v273_v50 = vmax.f32 %v207_v42, 0.0  ;;  %v278_v1 = vmax.f32 %v232_v58, 0.0  ;;  %v247_v5 = vadd.f32 %v1542_v44, %v1312_v32 }
  0xd0   :  { %v1533_v46 = vpop.f32.mrf.mxu0  ;;  %1566 = vmatmul.mubr.msk.f32.vlgmr.msra.gmra.mxu1 %vm301_vm3, %v271_v41  ;;  %v241_v47 = vpop.f32.mrf.mxu1 }
  0xd1   :  { %v272_v48 = vmax.f32 %v202_v45, 0.0  ;;  %v217_v49 = vadd.f32 %v1533_v46, %v1312_v32  ;;  %v242_v2 = vadd.f32 %v1312_v32, %v241_v47  ;;  %v281_v9 = vmax.f32 %v247_v5, 0.0  ;;  %1630 = vmatpush3.msk.msra.mxu1 %vm350_vm2, %v749_v20  ;;  %v1348_v20 = vld [vmem:[%s2171_s6] ss:$0 sm:$0xff] }
  0xd2   :  { %v211_v51 = vpop.f32.mrf.mxu0  ;;  %v1545_v52 = vpop.f32.mrf.mxu1  ;;  %1631 = vmatprep.subr.mxu1 %v748_v21 }
  0xd3   :  { %v212_v53 = vadd.f32 %v1312_v32, %v211_v51  ;;  %1568 = vmatprep.mubr.msk.f32.mxu1 %vm301_vm3, %v272_v48  ;;  %v275_v54 = vmax.f32 %v217_v49, 0.0  ;;  %v280_v6 = vmax.f32 %v242_v2, 0.0  ;;  %v257_v10 = vadd.f32 %v1545_v52, %v1312_v32  ;;  %1632 = vmatpush3.msra.mxu1 %v748_v21 }
  0xd4   :  { %v1536_v55 = vpop.f32.mrf.mxu0  ;;  %1569 = vmatmul.mubr.msk.f32.gmra.mxu1 %vm301_vm3, %v273_v50  ;;  %v251_v60 = vpop.f32.mrf.mxu1  ;;  %1633 = vmatprep.subr.mxu1 %v747_v22 }
  0xd5   :  { %v274_v56 = vmax.f32 %v212_v53, 0.0  ;;  %v227_v57 = vadd.f32 %v1536_v55, %v1312_v32  ;;  %v252_v7 = vadd.f32 %v1312_v32, %v251_v60  ;;  %v283_v13 = vmax.f32 %v257_v10, 0.0  ;;  %1634 = vmatpush3.msra.mxu1 %v747_v22 }
  0xd6   :  { %v221_v59 = vpop.f32.mrf.mxu0  ;;  %v1548_v3 = vpop.f32.mrf.mxu1  ;;  %1635 = vmatprep.subr.mxu1 %v746_v23 }
  0xd7   :  { %v222_v61 = vadd.f32 %v1312_v32, %v221_v59  ;;  %1571 = vmatprep.mubr.msk.f32.mxu1 %vm301_vm3, %v274_v56  ;;  %v277_v62 = vmax.f32 %v227_v57, 0.0  ;;  %v282_v11 = vmax.f32 %v252_v7, 0.0  ;;  %v267_v14 = vadd.f32 %v1548_v3, %v1312_v32  ;;  %1636 = vmatpush3.msra.mxu1 %v746_v23 }
  0xd8   :  { %1572 = vmatmul.mubr.msk.f32.gmra.mxu1 %vm301_vm3, %v275_v54  ;;  %v261_v8 = vpop.f32.mrf.mxu1  ;;  %1637 = vmatprep.subr.mxu1 %v745_v24 }
  0xd9   :  { %v276_v0 = vmax.f32 %v222_v61, 0.0  ;;  %v262_v12 = vadd.f32 %v1312_v32, %v261_v8  ;;  %v285_v16 = vmax.f32 %v267_v14, 0.0  ;;  %1638 = vmatpush3.msra.mxu1 %v745_v24  ;;  %v975_v14 = vld [vmem:[%s2170_s9 + $0x30] sm:$0xff] }
  0xda   :  { %1639 = vmatprep.subr.mxu1 %v744_v25 }
  0xdb   :  { %1574 = vmatprep.mubr.msk.f32.mxu1 %vm301_vm3, %v276_v0  ;;  %v284_v15 = vmax.f32 %v262_v12, 0.0  ;;  %1640 = vmatpush3.msra.mxu1 %v744_v25  ;;  %v742_v12 = vld [vmem:[%s2168_s7] sm:$0xff] }
  0xdc   :  { %1575 = vmatmul.mubr.msk.f32.gmra.mxu1 %vm301_vm3, %v277_v62  ;;  %1641 = vmatprep.subr.mxu1 %v743_v26 }
  0xdd   :  { %1577 = vmatprep.mubr.msk.f32.mxu1 %vm301_vm3, %v278_v1  ;;  %1642 = vmatpush3.msra.mxu1 %v743_v26 }
  0xde   :  { %1643 = vmatprep.subr.mxu1 %v742_v12 }
  0xdf   :  { %1644 = vmatpush3.msra.mxu1 %v742_v12 }
  0xe0   :  { %1578 = vmatmul.mubr.msk.f32.gmra.mxu1 %vm301_vm3, %v279_v4 }
  0xe1   :  { %1580 = vmatprep.mubr.msk.f32.mxu1 %vm301_vm3, %v280_v6 }
  0xe4   :  { %1581 = vmatmul.mubr.msk.f32.gmra.mxu1 %vm301_vm3, %v281_v9 }
  0xe5   :  { %1583 = vmatprep.mubr.msk.f32.mxu1 %vm301_vm3, %v282_v11 }
  0xe8   :  { %1584 = vmatmul.mubr.msk.f32.gmra.mxu1 %vm301_vm3, %v283_v13  ;;  %v976_v13 = vld [vmem:[%s2170_s9 + $0x38] sm:$0xf] }
  0xe9   :  { %1586 = vmatprep.mubr.msk.f32.mxu1 %vm301_vm3, %v284_v15  ;;  %1669 = vmatprep.subr.msk.mxu0 %vm350_vm2, %v976_v13  ;;  %v974_v15 = vld [vmem:[%s2170_s9 + $0x28] sm:$0xff] }
  0xec   :  { %1587 = vmatmul.mubr.msk.f32.gmra.mxu1 %vm301_vm3, %v285_v16  ;;  %v973_v16 = vld [vmem:[%s2170_s9 + $0x20] sm:$0xff] }
 0x190   :  { %v1567_v28 = vpop.f32.mrf.mxu1 }
 0x191   :  { %v426_v29 = vadd.f32 %v1567_v28, %v1330_v27 }
 0x192   :  { %v420_v30 = vpop.f32.mrf.mxu1 }
 0x193   :  { %v421_v31 = vadd.f32 %v1330_v27, %v420_v30  ;;  %v500_v34 = vmax.f32 %v426_v29, 0.0 }
 0x194   :  { %v1570_v32 = vpop.f32.mrf.mxu1 }
 0x195   :  { %v499_v33 = vmax.f32 %v421_v31, 0.0  ;;  %v436_v35 = vadd.f32 %v1570_v32, %v1330_v27 }
 0x196   :  { %v430_v36 = vpop.f32.mrf.mxu1 }
 0x197   :  { %v431_v37 = vadd.f32 %v1330_v27, %v430_v36  ;;  %1605 = vmatprep.mubr.msk.f32.mxu0 %vm301_vm3, %v499_v33  ;;  %v502_v40 = vmax.f32 %v436_v35, 0.0 }
 0x198   :  { %v1573_v38 = vpop.f32.mrf.mxu1  ;;  %1606 = vmatmul.mubr.msk.f32.vlgmr.msra.gmra.mxu0 %vm301_vm3, %v500_v34 }
 0x199   :  { %v501_v39 = vmax.f32 %v431_v37, 0.0  ;;  %v446_v41 = vadd.f32 %v1573_v38, %v1330_v27  ;;  %1670 = vmatpush3.msk.msra.mxu0 %vm350_vm2, %v976_v13 }
 0x19a   :  { %v440_v42 = vpop.f32.mrf.mxu1  ;;  %1671 = vmatprep.subr.mxu0 %v975_v14 }
 0x19b   :  { %v441_v43 = vadd.f32 %v1330_v27, %v440_v42  ;;  %1608 = vmatprep.mubr.msk.f32.mxu0 %vm301_vm3, %v501_v39  ;;  %v504_v46 = vmax.f32 %v446_v41, 0.0  ;;  %1672 = vmatpush3.msra.mxu0 %v975_v14 }
 0x19c   :  { %v1576_v44 = vpop.f32.mrf.mxu1  ;;  %1609 = vmatmul.mubr.msk.f32.gmra.mxu0 %vm301_vm3, %v502_v40  ;;  %1673 = vmatprep.subr.mxu0 %v974_v15 }
 0x19d   :  { %v503_v45 = vmax.f32 %v441_v43, 0.0  ;;  %v456_v47 = vadd.f32 %v1576_v44, %v1330_v27  ;;  %1674 = vmatpush3.msra.mxu0 %v974_v15 }
 0x19e   :  { %v450_v48 = vpop.f32.mrf.mxu1  ;;  %1675 = vmatprep.subr.mxu0 %v973_v16 }
 0x19f   :  { %v451_v49 = vadd.f32 %v1330_v27, %v450_v48  ;;  %1611 = vmatprep.mubr.msk.f32.mxu0 %vm301_vm3, %v503_v45  ;;  %v506_v52 = vmax.f32 %v456_v47, 0.0  ;;  %1676 = vmatpush3.msra.mxu0 %v973_v16 }
 0x1a0   :  { %v1579_v50 = vpop.f32.mrf.mxu1  ;;  %1612 = vmatmul.mubr.msk.f32.gmra.mxu0 %vm301_vm3, %v504_v46  ;;  %1677 = vmatprep.subr.mxu0 %v972_v17 }
 0x1a1   :  { %v505_v51 = vmax.f32 %v451_v49, 0.0  ;;  %v466_v53 = vadd.f32 %v1579_v50, %v1330_v27  ;;  %1678 = vmatpush3.msra.mxu0 %v972_v17 }
 0x1a2   :  { %v460_v54 = vpop.f32.mrf.mxu1  ;;  %1679 = vmatprep.subr.mxu0 %v971_v18 }
 0x1a3   :  { %v461_v55 = vadd.f32 %v1330_v27, %v460_v54  ;;  %1614 = vmatprep.mubr.msk.f32.mxu0 %vm301_vm3, %v505_v51  ;;  %v508_v58 = vmax.f32 %v466_v53, 0.0  ;;  %1680 = vmatpush3.msra.mxu0 %v971_v18 }
 0x1a4   :  { %v1582_v56 = vpop.f32.mrf.mxu1  ;;  %1615 = vmatmul.mubr.msk.f32.gmra.mxu0 %vm301_vm3, %v506_v52  ;;  %1681 = vmatprep.subr.mxu0 %v970_v19 }
 0x1a5   :  { %v507_v57 = vmax.f32 %v461_v55, 0.0  ;;  %v476_v59 = vadd.f32 %v1582_v56, %v1330_v27  ;;  %1682 = vmatpush3.msra.mxu0 %v970_v19 }
 0x1a6   :  { %v470_v60 = vpop.f32.mrf.mxu1 }
 0x1a7   :  { %v471_v61 = vadd.f32 %v1330_v27, %v470_v60  ;;  %1617 = vmatprep.mubr.msk.f32.mxu0 %vm301_vm3, %v507_v57  ;;  %v510_v0 = vmax.f32 %v476_v59, 0.0 }
 0x1a8   :  { %v1585_v62 = vpop.f32.mrf.mxu1  ;;  %1618 = vmatmul.mubr.msk.f32.gmra.mxu0 %vm301_vm3, %v508_v58 }
 0x1a9   :  { %v509_v63 = vmax.f32 %v471_v61, 0.0  ;;  %v486_v1 = vadd.f32 %v1585_v62, %v1330_v27 }
 0x1aa   :  { %v480_v2 = vpop.f32.mrf.mxu1 }
 0x1ab   :  { %v481_v3 = vadd.f32 %v1330_v27, %v480_v2  ;;  %1620 = vmatprep.mubr.msk.f32.mxu0 %vm301_vm3, %v509_v63  ;;  %v512_v6 = vmax.f32 %v486_v1, 0.0 }
 0x1ac   :  { %v1588_v4 = vpop.f32.mrf.mxu1  ;;  %1621 = vmatmul.mubr.msk.f32.gmra.mxu0 %vm301_vm3, %v510_v0 }
 0x1ad   :  { %v511_v5 = vmax.f32 %v481_v3, 0.0  ;;  %v496_v7 = vadd.f32 %v1588_v4, %v1330_v27 }
 0x1ae   :  { %v490_v8 = vpop.f32.mrf.mxu1 }
 0x1af   :  { %v491_v9 = vadd.f32 %v1330_v27, %v490_v8  ;;  %1623 = vmatprep.mubr.msk.f32.mxu0 %vm301_vm3, %v511_v5  ;;  %v514_v11 = vmax.f32 %v496_v7, 0.0  ;;  %v969_v5 = vld [vmem:[%s2170_s9] sm:$0xff] }
 0x1b0   :  { %1624 = vmatmul.mubr.msk.f32.gmra.mxu0 %vm301_vm3, %v512_v6  ;;  %1683 = vmatprep.subr.mxu0 %v969_v5  ;;  %v1366_v6 = vld [vmem:[%s2172_s8] ss:$0 sm:$0xff] }
 0x1b1   :  { %v513_v10 = vmax.f32 %v491_v9, 0.0  ;;  %1684 = vmatpush3.msra.mxu0 %v969_v5 }
 0x1b3   :  { %1626 = vmatprep.mubr.msk.f32.mxu0 %vm301_vm3, %v513_v10 }
 0x1b4   :  { %1627 = vmatmul.mubr.msk.f32.gmra.mxu0 %vm301_vm3, %v514_v11 }
 0x258   :  { %v1607_v21 = vpop.f32.mrf.mxu0 }
 0x259   :  { %v653_v22 = vadd.f32 %v1607_v21, %v1348_v20 }
 0x25a   :  { %v647_v23 = vpop.f32.mrf.mxu0 }
 0x25b   :  { %v648_v24 = vadd.f32 %v1348_v20, %v647_v23  ;;  %v727_v27 = vmax.f32 %v653_v22, 0.0 }
 0x25c   :  { %v1610_v25 = vpop.f32.mrf.mxu0 }
 0x25d   :  { %v726_v26 = vmax.f32 %v648_v24, 0.0  ;;  %v663_v28 = vadd.f32 %v1610_v25, %v1348_v20 }
 0x25e   :  { %v657_v29 = vpop.f32.mrf.mxu0 }
 0x25f   :  { %v658_v30 = vadd.f32 %v1348_v20, %v657_v29  ;;  %1645 = vmatprep.mubr.msk.f32.mxu1 %vm301_vm3, %v726_v26  ;;  %v729_v33 = vmax.f32 %v663_v28, 0.0 }
 0x260   :  { %v1613_v31 = vpop.f32.mrf.mxu0  ;;  %1646 = vmatmul.mubr.msk.f32.vlgmr.msra.gmra.mxu1 %vm301_vm3, %v727_v27 }
 0x261   :  { %v728_v32 = vmax.f32 %v658_v30, 0.0  ;;  %v673_v34 = vadd.f32 %v1613_v31, %v1348_v20 }
 0x262   :  { %v667_v35 = vpop.f32.mrf.mxu0 }
 0x263   :  { %v668_v36 = vadd.f32 %v1348_v20, %v667_v35  ;;  %1648 = vmatprep.mubr.msk.f32.mxu1 %vm301_vm3, %v728_v32  ;;  %v731_v39 = vmax.f32 %v673_v34, 0.0 }
 0x264   :  { %v1616_v37 = vpop.f32.mrf.mxu0  ;;  %1649 = vmatmul.mubr.msk.f32.gmra.mxu1 %vm301_vm3, %v729_v33 }
 0x265   :  { %v730_v38 = vmax.f32 %v668_v36, 0.0  ;;  %v683_v40 = vadd.f32 %v1616_v37, %v1348_v20 }
 0x266   :  { %v677_v41 = vpop.f32.mrf.mxu0 }
 0x267   :  { %v678_v42 = vadd.f32 %v1348_v20, %v677_v41  ;;  %1651 = vmatprep.mubr.msk.f32.mxu1 %vm301_vm3, %v730_v38  ;;  %v733_v45 = vmax.f32 %v683_v40, 0.0 }
 0x268   :  { %v1619_v43 = vpop.f32.mrf.mxu0  ;;  %1652 = vmatmul.mubr.msk.f32.gmra.mxu1 %vm301_vm3, %v731_v39 }
 0x269   :  { %v732_v44 = vmax.f32 %v678_v42, 0.0  ;;  %v693_v46 = vadd.f32 %v1619_v43, %v1348_v20 }
 0x26a   :  { %v687_v47 = vpop.f32.mrf.mxu0 }
 0x26b   :  { %v688_v48 = vadd.f32 %v1348_v20, %v687_v47  ;;  %1654 = vmatprep.mubr.msk.f32.mxu1 %vm301_vm3, %v732_v44  ;;  %v735_v51 = vmax.f32 %v693_v46, 0.0 }
 0x26c   :  { %v1622_v49 = vpop.f32.mrf.mxu0  ;;  %1655 = vmatmul.mubr.msk.f32.gmra.mxu1 %vm301_vm3, %v733_v45 }
 0x26d   :  { %v734_v50 = vmax.f32 %v688_v48, 0.0  ;;  %v703_v52 = vadd.f32 %v1622_v49, %v1348_v20 }
 0x26e   :  { %v697_v53 = vpop.f32.mrf.mxu0 }
 0x26f   :  { %v698_v54 = vadd.f32 %v1348_v20, %v697_v53  ;;  %1657 = vmatprep.mubr.msk.f32.mxu1 %vm301_vm3, %v734_v50  ;;  %v737_v57 = vmax.f32 %v703_v52, 0.0 }
 0x270   :  { %v1625_v55 = vpop.f32.mrf.mxu0  ;;  %1658 = vmatmul.mubr.msk.f32.gmra.mxu1 %vm301_vm3, %v735_v51 }
 0x271   :  { %v736_v56 = vmax.f32 %v698_v54, 0.0  ;;  %v713_v58 = vadd.f32 %v1625_v55, %v1348_v20  ;;  %v18_v55 = vstv %s2173_s12 }
 0x272   :  { %v707_v59 = vpop.f32.mrf.mxu0  ;;  %19 = vst [vmem:[#allocation2] sm:$0x1] %v18_v55 }
 0x273   :  { %v708_v60 = vadd.f32 %v1348_v20, %v707_v59  ;;  %1660 = vmatprep.mubr.msk.f32.mxu1 %vm301_vm3, %v736_v56  ;;  %v739_v63 = vmax.f32 %v713_v58, 0.0  ;;  %v2044_v56 = vld [vmem:[%s2174_s10] ss:$0 sm:$0xff] }
 0x274   :  { %v1628_v61 = vpop.f32.mrf.mxu0  ;;  %1661 = vmatmul.mubr.msk.f32.gmra.mxu1 %vm301_vm3, %v737_v57 }
 0x275   :  { %v738_v62 = vmax.f32 %v708_v60, 0.0  ;;  %v723_v0 = vadd.f32 %v1628_v61, %v1348_v20  ;;  %v2050_v60 = vld [vmem:[%s2175_s11] ss:$0 sm:$0xff] }
 0x276   :  { %v717_v1 = vpop.f32.mrf.mxu0 }
 0x277   :  { %v718_v2 = vadd.f32 %v1348_v20, %v717_v1  ;;  %1663 = vmatprep.mubr.msk.f32.mxu1 %vm301_vm3, %v738_v62  ;;  %v741_v4 = vmax.f32 %v723_v0, 0.0 }
 0x278   :  { %1664 = vmatmul.mubr.msk.f32.gmra.mxu1 %vm301_vm3, %v739_v63 }
 0x279   :  { %v740_v3 = vmax.f32 %v718_v2, 0.0 }
 0x27b   :  { %1666 = vmatprep.mubr.msk.f32.mxu1 %vm301_vm3, %v740_v3 }
 0x27c   :  { %1667 = vmatmul.mubr.msk.f32.gmra.mxu1 %vm301_vm3, %v741_v4 }
 0x320   :  { %v1647_v7 = vpop.f32.mrf.mxu1 }
 0x321   :  { %v880_v8 = vadd.f32 %v1647_v7, %v1366_v6 }
 0x322   :  { %v874_v9 = vpop.f32.mrf.mxu1 }
 0x323   :  { %v875_v10 = vadd.f32 %v1366_v6, %v874_v9  ;;  %v954_v13 = vmax.f32 %v880_v8, 0.0 }
 0x324   :  { %v1650_v11 = vpop.f32.mrf.mxu1 }
 0x325   :  { %v953_v12 = vmax.f32 %v875_v10, 0.0  ;;  %v890_v14 = vadd.f32 %v1650_v11, %v1366_v6 }
 0x326   :  { %v884_v15 = vpop.f32.mrf.mxu1 }
 0x327   :  { %v885_v16 = vadd.f32 %v1366_v6, %v884_v15  ;;  %1685 = vmatprep.mubr.msk.f32.mxu0 %vm301_vm3, %v953_v12  ;;  %v956_v19 = vmax.f32 %v890_v14, 0.0 }
 0x328   :  { %v1653_v17 = vpop.f32.mrf.mxu1  ;;  %1686 = vmatmul.mubr.msk.f32.vlgmr.msra.gmra.mxu0 %vm301_vm3, %v954_v13 }
 0x329   :  { %v955_v18 = vmax.f32 %v885_v16, 0.0  ;;  %v900_v20 = vadd.f32 %v1653_v17, %v1366_v6 }
 0x32a   :  { %v894_v21 = vpop.f32.mrf.mxu1 }
 0x32b   :  { %v895_v22 = vadd.f32 %v1366_v6, %v894_v21  ;;  %1688 = vmatprep.mubr.msk.f32.mxu0 %vm301_vm3, %v955_v18  ;;  %v958_v25 = vmax.f32 %v900_v20, 0.0 }
 0x32c   :  { %v1656_v23 = vpop.f32.mrf.mxu1  ;;  %1689 = vmatmul.mubr.msk.f32.gmra.mxu0 %vm301_vm3, %v956_v19 }
 0x32d   :  { %v957_v24 = vmax.f32 %v895_v22, 0.0  ;;  %v910_v26 = vadd.f32 %v1656_v23, %v1366_v6 }
 0x32e   :  { %v904_v27 = vpop.f32.mrf.mxu1 }
 0x32f   :  { %v905_v28 = vadd.f32 %v1366_v6, %v904_v27  ;;  %1691 = vmatprep.mubr.msk.f32.mxu0 %vm301_vm3, %v957_v24  ;;  %v960_v31 = vmax.f32 %v910_v26, 0.0 }
 0x330   :  { %v1659_v29 = vpop.f32.mrf.mxu1  ;;  %1692 = vmatmul.mubr.msk.f32.gmra.mxu0 %vm301_vm3, %v958_v25 }
 0x331   :  { %v959_v30 = vmax.f32 %v905_v28, 0.0  ;;  %v920_v32 = vadd.f32 %v1659_v29, %v1366_v6 }
 0x332   :  { %v914_v33 = vpop.f32.mrf.mxu1 }
 0x333   :  { %v915_v34 = vadd.f32 %v1366_v6, %v914_v33  ;;  %1694 = vmatprep.mubr.msk.f32.mxu0 %vm301_vm3, %v959_v30  ;;  %v962_v37 = vmax.f32 %v920_v32, 0.0 }
 0x334   :  { %v1662_v35 = vpop.f32.mrf.mxu1  ;;  %1695 = vmatmul.mubr.msk.f32.gmra.mxu0 %vm301_vm3, %v960_v31 }
 0x335   :  { %v961_v36 = vmax.f32 %v915_v34, 0.0  ;;  %v930_v38 = vadd.f32 %v1662_v35, %v1366_v6 }
 0x336   :  { %v924_v39 = vpop.f32.mrf.mxu1 }
 0x337   :  { %v925_v40 = vadd.f32 %v1366_v6, %v924_v39  ;;  %1697 = vmatprep.mubr.msk.f32.mxu0 %vm301_vm3, %v961_v36  ;;  %v964_v43 = vmax.f32 %v930_v38, 0.0 }
 0x338   :  { %v1665_v41 = vpop.f32.mrf.mxu1  ;;  %1698 = vmatmul.mubr.msk.f32.gmra.mxu0 %vm301_vm3, %v962_v37 }
 0x339   :  { %v963_v42 = vmax.f32 %v925_v40, 0.0  ;;  %v940_v44 = vadd.f32 %v1665_v41, %v1366_v6 }
 0x33a   :  { %v934_v45 = vpop.f32.mrf.mxu1 }
 0x33b   :  { %v935_v46 = vadd.f32 %v1366_v6, %v934_v45  ;;  %1700 = vmatprep.mubr.msk.f32.mxu0 %vm301_vm3, %v963_v42  ;;  %v966_v49 = vmax.f32 %v940_v44, 0.0 }
 0x33c   :  { %v1668_v47 = vpop.f32.mrf.mxu1  ;;  %1701 = vmatmul.mubr.msk.f32.gmra.mxu0 %vm301_vm3, %v964_v43 }
 0x33d   :  { %v965_v48 = vmax.f32 %v935_v46, 0.0  ;;  %v950_v50 = vadd.f32 %v1668_v47, %v1366_v6 }
 0x33e   :  { %v944_v51 = vpop.f32.mrf.mxu1 }
 0x33f   :  { %v945_v52 = vadd.f32 %v1366_v6, %v944_v51  ;;  %1703 = vmatprep.mubr.msk.f32.mxu0 %vm301_vm3, %v965_v48  ;;  %v968_v54 = vmax.f32 %v950_v50, 0.0 }
 0x340   :  { %1704 = vmatmul.mubr.msk.f32.gmra.mxu0 %vm301_vm3, %v966_v49 }
 0x341   :  { %v967_v53 = vmax.f32 %v945_v52, 0.0 }
 0x343   :  { %1706 = vmatprep.mubr.msk.f32.mxu0 %vm301_vm3, %v967_v53 }
 0x344   :  { %1707 = vmatmul.mubr.msk.f32.gmra.mxu0 %vm301_vm3, %v968_v54 }
 0x3e8   :  { %v1687_v57 = vpop.f32.mrf.mxu0 }
 0x3e9   :  { %v1107_v58 = vadd.f32 %v1687_v57, %v2044_v56 }
 0x3ea   :  { %v1101_v59 = vpop.f32.mrf.mxu0 }
 0x3eb   :  { %v1181_v61 = vmax.f32 %v1107_v58, 0.0  ;;  %v1102_v62 = vadd.f32 %v2044_v56, %v1101_v59 }
 0x3ec   :  { %v1690_v63 = vpop.f32.mrf.mxu0 }
 0x3ed   :  { %v1180_v0 = vmax.f32 %v1102_v62, 0.0  ;;  %v1117_v1 = vadd.f32 %v1690_v63, %v2044_v56  ;;  %v1204_v2 = vmul.f32 %v2050_v60, %v1181_v61 }
 0x3ee   :  { %v1111_v3 = vpop.f32.mrf.mxu0 }
 0x3ef   :  { %v1183_v4 = vmax.f32 %v1117_v1, 0.0  ;;  %v1112_v5 = vadd.f32 %v2044_v56, %v1111_v3  ;;  %v1223_v6 = vsel %vm1219_vm4, %v1204_v2, 0.0  ;;  %v1203_v7 = vmul.f32 %v2050_v60, %v1180_v0 }
 0x3f0   :  { %1224 = vadd.xlane.f32.xlu0 %v1223_v6  ;;  %v1693_v8 = vpop.f32.mrf.mxu0 }
 0x3f1   :  { %v1182_v9 = vmax.f32 %v1112_v5, 0.0  ;;  %v1127_v10 = vadd.f32 %v1693_v8, %v2044_v56  ;;  %v1206_v11 = vmul.f32 %v2050_v60, %v1183_v4  ;;  %v1220_v13 = vsel %vm1219_vm4, %v1203_v7, 0.0 }
 0x3f2   :  { %v1121_v12 = vpop.f32.mrf.mxu0 }
 0x3f3   :  { %v1185_v14 = vmax.f32 %v1127_v10, 0.0  ;;  %v1122_v15 = vadd.f32 %v2044_v56, %v1121_v12  ;;  %v1229_v16 = vsel %vm1219_vm4, %v1206_v11, 0.0  ;;  %v1205_v17 = vmul.f32 %v2050_v60, %v1182_v9  ;;  %v1403_v11 = vld [vmem:[#allocation2] ss:$0 sm:$0xff] }
 0x3f4   :  { %1230 = vadd.xlane.f32.xlu1 %v1229_v16  ;;  %v1696_v18 = vpop.f32.mrf.mxu0  ;;  %1221 = vadd.xlane.f32.xlu0 %v1220_v13 }
 0x3f5   :  { %v1184_v19 = vmax.f32 %v1122_v15, 0.0  ;;  %v1137_v20 = vadd.f32 %v1696_v18, %v2044_v56  ;;  %v1226_v22 = vsel %vm1219_vm4, %v1205_v17, 0.0  ;;  %v1208_v26 = vmul.f32 %v2050_v60, %v1185_v14 }
 0x3f6   :  { %v1131_v21 = vpop.f32.mrf.mxu0 }
 0x3f7   :  { %v1187_v23 = vmax.f32 %v1137_v20, 0.0  ;;  %v1132_v24 = vadd.f32 %v2044_v56, %v1131_v21  ;;  %v1207_v25 = vmul.f32 %v2050_v60, %v1184_v19  ;;  %v1235_v35 = vsel %vm1219_vm4, %v1208_v26, 0.0 }
 0x3f8   :  { %v1699_v27 = vpop.f32.mrf.mxu0  ;;  %1227 = vadd.xlane.f32.xlu1 %v1226_v22 }
 0x3f9   :  { %v1186_v28 = vmax.f32 %v1132_v24, 0.0  ;;  %v1147_v29 = vadd.f32 %v1699_v27, %v2044_v56  ;;  %v1232_v30 = vsel %vm1219_vm4, %v1207_v25, 0.0  ;;  %v1210_v32 = vmul.f32 %v2050_v60, %v1187_v23 }
 0x3fa   :  { %v1141_v31 = vpop.f32.mrf.mxu0  ;;  %1233 = vadd.xlane.f32.xlu0 %v1232_v30 }
 0x3fb   :  { %v1189_v33 = vmax.f32 %v1147_v29, 0.0  ;;  %v1142_v34 = vadd.f32 %v2044_v56, %v1141_v31  ;;  %v1209_v36 = vmul.f32 %v2050_v60, %v1186_v28  ;;  %v1241_v42 = vsel %vm1219_vm4, %v1210_v32, 0.0 }
 0x3fc   :  { %v1702_v37 = vpop.f32.mrf.mxu0  ;;  %1236 = vadd.xlane.f32.xlu1 %v1235_v35 }
 0x3fd   :  { %v1188_v38 = vmax.f32 %v1142_v34, 0.0  ;;  %v1157_v39 = vadd.f32 %v1702_v37, %v2044_v56  ;;  %v1238_v40 = vsel %vm1219_vm4, %v1209_v36, 0.0  ;;  %v1212_v46 = vmul.f32 %v2050_v60, %v1189_v33 }
 0x3fe   :  { %v1151_v41 = vpop.f32.mrf.mxu0  ;;  %1239 = vadd.xlane.f32.xlu0 %v1238_v40 }
 0x3ff   :  { %v1191_v43 = vmax.f32 %v1157_v39, 0.0  ;;  %v1152_v44 = vadd.f32 %v2044_v56, %v1151_v41  ;;  %v1211_v45 = vmul.f32 %v2050_v60, %v1188_v38  ;;  %v1247_v55 = vsel %vm1219_vm4, %v1212_v46, 0.0 }
 0x400   :  { %v1705_v47 = vpop.f32.mrf.mxu0  ;;  %1242 = vadd.xlane.f32.xlu1 %v1241_v42 }
 0x401   :  { %v1190_v48 = vmax.f32 %v1152_v44, 0.0  ;;  %v1167_v49 = vadd.f32 %v1705_v47, %v2044_v56  ;;  %v1244_v50 = vsel %vm1219_vm4, %v1211_v45, 0.0  ;;  %v1214_v52 = vmul.f32 %v2050_v60, %v1191_v43 }
 0x402   :  { %v1161_v51 = vpop.f32.mrf.mxu0  ;;  %1245 = vadd.xlane.f32.xlu0 %v1244_v50 }
 0x403   :  { %v1193_v53 = vmax.f32 %v1167_v49, 0.0  ;;  %v1162_v54 = vadd.f32 %v2044_v56, %v1161_v51  ;;  %v1213_v57 = vmul.f32 %v2050_v60, %v1190_v48  ;;  %v1253_v0 = vsel %vm1219_vm4, %v1214_v52, 0.0 }
 0x404   :  { %v1708_v58 = vpop.f32.mrf.mxu0  ;;  %1248 = vadd.xlane.f32.xlu1 %v1247_v55 }
 0x405   :  { %v1192_v59 = vmax.f32 %v1162_v54, 0.0  ;;  %v1177_v61 = vadd.f32 %v1708_v58, %v2044_v56  ;;  %v1250_v62 = vsel %vm1219_vm4, %v1213_v57, 0.0  ;;  %v1216_v4 = vmul.f32 %v2050_v60, %v1193_v53 }
 0x406   :  { %v1171_v63 = vpop.f32.mrf.mxu0  ;;  %1251 = vadd.xlane.f32.xlu0 %v1250_v62 }
 0x407   :  { %v1195_v1 = vmax.f32 %v1177_v61, 0.0  ;;  %v1172_v2 = vadd.f32 %v2044_v56, %v1171_v63  ;;  %v1215_v3 = vmul.f32 %v2050_v60, %v1192_v59  ;;  %v1259_v7 = vsel %vm1219_vm4, %v1216_v4, 0.0 }
 0x408   :  { %1254 = vadd.xlane.f32.xlu1 %v1253_v0 }
 0x409   :  { %v1194_v5 = vmax.f32 %v1172_v2, 0.0  ;;  %v1256_v6 = vsel %vm1219_vm4, %v1215_v3, 0.0  ;;  %v1218_v9 = vmul.f32 %v2050_v60, %v1195_v1 }
 0x40a   :  { %1257 = vadd.xlane.f32.xlu0 %v1256_v6 }
 0x40b   :  { %v1217_v8 = vmul.f32 %v2050_v60, %v1194_v5  ;;  %v1265_v56 = vsel %vm1219_vm4, %v1218_v9, 0.0 }
 0x40c   :  { %1260 = vadd.xlane.f32.xlu1 %v1259_v7 }
 0x40d   :  { %v1262_v10 = vsel %vm1219_vm4, %v1217_v8, 0.0 }
 0x40e   :  { %1263 = vadd.xlane.f32.xlu0 %v1262_v10 }
 0x410   :  { %1266 = vadd.xlane.f32.xlu1 %v1265_v56 }
 0x479   :  { %v1225_v12 = vpop.xlane.xlu0 %1224 }
 0x47a   :  { %v1276_v13 = vadd.f32 %v1403_v11, %v1225_v12 }
 0x47c   :  { %1293 = vst.msk [vmem:[%s2176_s13 + $0x8] sm:$0xff] %vm1291_vm5, %v1276_v13 }
 0x47d   :  { %v1231_v14 = vpop.xlane.xlu1 %1230  ;;  %v1222_v15 = vpop.xlane.xlu0 %1221 }
 0x47e   :  { %v1278_v16 = vadd.f32 %v1403_v11, %v1231_v14  ;;  %v1275_v60 = vadd.f32 %v1403_v11, %v1222_v15 }
 0x480   :  { %1295 = vst.msk [vmem:[%s2176_s13 + $0x18] sm:$0xff] %vm1291_vm5, %v1278_v16  ;;  %1292 = vst.msk [vmem:[%s2176_s13] sm:$0xff] %vm1291_vm5, %v1275_v60 }
 0x481   :  { %v1228_v17 = vpop.xlane.xlu1 %1227 }
 0x482   :  { %v1277_v18 = vadd.f32 %v1403_v11, %v1228_v17 }
 0x483   :  { %v1234_v19 = vpop.xlane.xlu0 %1233 }
 0x484   :  { %1294 = vst.msk [vmem:[%s2176_s13 + $0x10] sm:$0xff] %vm1291_vm5, %v1277_v18  ;;  %v1279_v20 = vadd.f32 %v1403_v11, %v1234_v19 }
 0x485   :  { %v1237_v21 = vpop.xlane.xlu1 %1236 }
 0x486   :  { %1296 = vst.msk [vmem:[%s2176_s13 + $0x20] sm:$0xff] %vm1291_vm5, %v1279_v20  ;;  %v1280_v22 = vadd.f32 %v1403_v11, %v1237_v21 }
 0x487   :  { %v1240_v23 = vpop.xlane.xlu0 %1239 }
 0x488   :  { %1297 = vst.msk [vmem:[%s2176_s13 + $0x28] sm:$0xff] %vm1291_vm5, %v1280_v22  ;;  %v1281_v24 = vadd.f32 %v1403_v11, %v1240_v23 }
 0x489   :  { %v1243_v25 = vpop.xlane.xlu1 %1242 }
 0x48a   :  { %1298 = vst.msk [vmem:[%s2176_s13 + $0x30] sm:$0xff] %vm1291_vm5, %v1281_v24  ;;  %v1282_v26 = vadd.f32 %v1403_v11, %v1243_v25 }
 0x48b   :  { %v1246_v27 = vpop.xlane.xlu0 %1245 }
 0x48c   :  { %1299 = vst.msk [vmem:[%s2176_s13 + $0x38] sm:$0xff] %vm1291_vm5, %v1282_v26  ;;  %v1283_v28 = vadd.f32 %v1403_v11, %v1246_v27 }
 0x48d   :  { %v1249_v29 = vpop.xlane.xlu1 %1248 }
 0x48e   :  { %1300 = vst.msk [vmem:[%s2176_s13 + $0x40] sm:$0xff] %vm1291_vm5, %v1283_v28  ;;  %v1284_v30 = vadd.f32 %v1403_v11, %v1249_v29 }
 0x48f   :  { %v1252_v31 = vpop.xlane.xlu0 %1251 }
 0x490   :  { %1301 = vst.msk [vmem:[%s2176_s13 + $0x48] sm:$0xff] %vm1291_vm5, %v1284_v30  ;;  %v1285_v32 = vadd.f32 %v1403_v11, %v1252_v31 }
 0x491   :  { %v1255_v33 = vpop.xlane.xlu1 %1254 }
 0x492   :  { %1302 = vst.msk [vmem:[%s2176_s13 + $0x50] sm:$0xff] %vm1291_vm5, %v1285_v32  ;;  %v1286_v34 = vadd.f32 %v1403_v11, %v1255_v33 }
 0x493   :  { %v1258_v35 = vpop.xlane.xlu0 %1257 }
 0x494   :  { %1303 = vst.msk [vmem:[%s2176_s13 + $0x58] sm:$0xff] %vm1291_vm5, %v1286_v34  ;;  %v1287_v36 = vadd.f32 %v1403_v11, %v1258_v35 }
 0x495   :  { %v1261_v37 = vpop.xlane.xlu1 %1260 }
 0x496   :  { %1304 = vst.msk [vmem:[%s2176_s13 + $0x60] sm:$0xff] %vm1291_vm5, %v1287_v36  ;;  %v1288_v38 = vadd.f32 %v1403_v11, %v1261_v37 }
 0x497   :  { %v1264_v39 = vpop.xlane.xlu0 %1263 }
 0x498   :  { %1305 = vst.msk [vmem:[%s2176_s13 + $0x68] sm:$0xff] %vm1291_vm5, %v1288_v38  ;;  %v1289_v40 = vadd.f32 %v1403_v11, %v1264_v39 }
 0x499   :  { %v1267_v41 = vpop.xlane.xlu1 %1266 }
 0x49a   :  { %1306 = vst.msk [vmem:[%s2176_s13 + $0x70] sm:$0xff] %vm1291_vm5, %v1289_v40  ;;  %v1290_v42 = vadd.f32 %v1403_v11, %v1267_v41 }
 0x49c   :  { %1307 = vst.msk [vmem:[%s2176_s13 + $0x78] sm:$0xff] %vm1291_vm5, %v1290_v42 }

</bundles_post_ra>
